<compile_context>
chip_gen: v6e
topology: v6e:2x2x1
jax: 0.10.0
libtpu: 0.0.40
codegen_flags: <defaults>
</compile_context>

<pallas_src>
import jax
import jax.numpy as jnp
from jax.experimental import pallas as pl
from jax.experimental.pallas import tpu as pltpu

_LANE = 128
_NEG = -1e30  # masks padded logit lanes out of the log-softmax


def _round_up(n, m):
    return pl.cdiv(n, m) * m


def lstm_seq_kernel(x_ref, h0_ref, c0_ref, wx_ref, wh_ref, bg_ref,
                    wo_ref, bo_ref,
                    out_ref, h_out_ref, c_out_ref,
                    h_scr, c_scr):
    t = pl.program_id(0)

    # Load the initial carried state once; afterwards it lives in VMEM scratch.
    @pl.when(t == 0)
    def _init():
        h_scr[...] = h0_ref[...]
        c_scr[...] = c0_ref[...]

    x_t = x_ref[0]                       # (B, I)
    h_prev = h_scr[...]                  # (B, Cp)
    c_prev = c_scr[...]                  # (B, Cp)

    # gate Linear on cat([x, h], 1) == x @ Wx + h @ Wh  (weights VMEM-resident)
    g = (jnp.dot(x_t, wx_ref[...], preferred_element_type=jnp.float32)
         + jnp.dot(h_prev, wh_ref[...], preferred_element_type=jnp.float32)
         + bg_ref[...])                  # (B, Cp)

    gate = jax.nn.sigmoid(g)             # f == i == o (same Linear, same input)
    z = jnp.tanh(g)

    c_new = c_prev * gate + z * gate     # cell*f + z*i
    h_new = jnp.tanh(c_new) * gate       # tanh(cell')*o

    # output Linear + LogSoftmax(dim=1); padded lanes have bias -1e30 so they
    # contribute exp(.) == 0 to the normalizer.
    logits = (jnp.dot(h_new, wo_ref[...], preferred_element_type=jnp.float32)
              + bo_ref[...])             # (B, Op)
    m = jnp.max(logits, axis=1, keepdims=True)
    lse = m + jnp.log(jnp.sum(jnp.exp(logits - m), axis=1, keepdims=True))
    out_ref[0] = logits - lse

    # carry state to the next grid step
    h_scr[...] = h_new
    c_scr[...] = c_new

    @pl.when(t == pl.num_programs(0) - 1)
    def _final():
        h_out_ref[...] = h_new
        c_out_ref[...] = c_new


def prepare_params(w_gate, b_gate, w_out, b_out, input_size):
    """Split the gate weight into Wx/Wh and lane-pad all params (done once)."""
    ih, C = w_gate.shape
    H = ih - input_size
    O = w_out.shape[1]
    Cp = _round_up(max(C, H), _LANE)
    Op = _round_up(O, _LANE)

    wx = jnp.pad(w_gate[:input_size].astype(jnp.float32),
                 ((0, 0), (0, Cp - C)))                               # (I, Cp)
    wh = jnp.pad(w_gate[input_size:].astype(jnp.float32),
                 ((0, Cp - H), (0, Cp - C)))                          # (Cp, Cp)
    bg = jnp.pad(b_gate.astype(jnp.float32), ((0, 0), (0, Cp - C)))   # (1, Cp)
    wo = jnp.pad(w_out.astype(jnp.float32),
                 ((0, Cp - H), (0, Op - O)))                          # (Cp, Op)
    bo = jnp.concatenate(
        [b_out.astype(jnp.float32),
         jnp.full((1, Op - O), _NEG, jnp.float32)], axis=1)           # (1, Op)
    return wx, wh, bg, wo, bo


def lstm_cell_rollout(xs, hidden0, cell0, w_gate, b_gate, w_out, b_out):
    """Apply the LSTMCell module to T timesteps inside one fused kernel.

    xs: (T, B, I); hidden0: (B, H); cell0: (B, C), with H == C.
    Returns (log_probs (T, B, O), hidden_T (B, H), cell_T (B, C)).
    """
    T, B, I = xs.shape
    H = hidden0.shape[1]
    C = cell0.shape[1]
    O = w_out.shape[1]
    Cp = _round_up(max(C, H), _LANE)
    Op = _round_up(O, _LANE)

    wx, wh, bg, wo, bo = prepare_params(w_gate, b_gate, w_out, b_out, I)
    h0 = jnp.pad(hidden0.astype(jnp.float32), ((0, 0), (0, Cp - H)))
    c0 = jnp.pad(cell0.astype(jnp.float32), ((0, 0), (0, Cp - C)))
    xs = xs.astype(jnp.float32)

    def const2(shape):
        return pl.BlockSpec(shape, lambda t: (0, 0))

    grid_spec = pltpu.PrefetchScalarGridSpec(
        num_scalar_prefetch=0,
        grid=(T,),
        in_specs=[
            pl.BlockSpec((1, B, I), lambda t: (t, 0, 0)),   # x_t
            const2((B, Cp)),                                # h0
            const2((B, Cp)),                                # c0
            const2((I, Cp)),                                # Wx   (resident)
            const2((Cp, Cp)),                               # Wh   (resident)
            const2((1, Cp)),                                # b_gate
            const2((Cp, Op)),                               # Wo   (resident)
            const2((1, Op)),                                # b_out
        ],
        out_specs=(
            pl.BlockSpec((1, B, Op), lambda t: (t, 0, 0)),  # per-step log-probs
            const2((B, Cp)),                                # final hidden
            const2((B, Cp)),                                # final cell
        ),
        scratch_shapes=[
            pltpu.VMEM((B, Cp), jnp.float32),   # h carry
            pltpu.VMEM((B, Cp), jnp.float32),   # c carry
        ],
    )

    flops = 2 * T * B * ((I + H) * C + H * O)
    transcendentals = T * B * (3 * C + O)
    bytes_accessed = 4 * (xs.size + wx.size + wh.size + bg.size + wo.size
                          + bo.size + 2 * B * Cp + T * B * Op + 2 * B * Cp)

    out_p, h_p, c_p = pl.pallas_call(
        lstm_seq_kernel,
        out_shape=(
            jax.ShapeDtypeStruct((T, B, Op), jnp.float32),
            jax.ShapeDtypeStruct((B, Cp), jnp.float32),
            jax.ShapeDtypeStruct((B, Cp), jnp.float32),
        ),
        grid_spec=grid_spec,
        compiler_params=pltpu.CompilerParams(
            dimension_semantics=("arbitrary",)),   # time axis carries state
        cost_estimate=pl.CostEstimate(
            flops=flops, transcendentals=transcendentals,
            bytes_accessed=bytes_accessed),
    )(xs, h0, c0, wx, wh, bg, wo, bo)

    return out_p[:, :, :O], h_p[:, :H], c_p[:, :C]


def lstm_cell_forward(x, hidden, cell, w_gate, b_gate, w_out, b_out):
    """The literal single-step module forward (T == 1 rollout)."""
    out, h, c = lstm_cell_rollout(x[None], hidden, cell,
                                  w_gate, b_gate, w_out, b_out)
    return out[0], h, c


def init_linear(key, in_features, out_features):
    """PyTorch nn.Linear default init: U(-1/sqrt(fan_in), 1/sqrt(fan_in))."""
    kw, kb = jax.random.split(key)
    bound = 1.0 / jnp.sqrt(jnp.float32(in_features))
    # stored as (in_features, out_features) == torch weight transposed
    w = jax.random.uniform(kw, (in_features, out_features), jnp.float32,
                           minval=-bound, maxval=bound)
    b = jax.random.uniform(kb, (1, out_features), jnp.float32,
                           minval=-bound, maxval=bound)
    return w, b


if __name__ == "__main__":
    # shapes implied by the module: input = torch.randn(32, 10) -> batch=32, input_size=10
    seq_len, batch, input_size = 8, 32, 10
    hidden_size = cell_size = 32   # module requires hidden_size == cell_size
    output_size = 16

    key = jax.random.PRNGKey(0)
    k_x, k_h, k_c, k_g, k_o = jax.random.split(key, 5)

    xs = jax.random.normal(k_x, (seq_len, batch, input_size), jnp.float32)
    hidden0 = jax.random.normal(k_h, (batch, hidden_size), jnp.float32)
    cell0 = jax.random.normal(k_c, (batch, cell_size), jnp.float32)

    w_gate, b_gate = init_linear(k_g, input_size + hidden_size, cell_size)
    w_out, b_out = init_linear(k_o, hidden_size, output_size)

    log_probs, hidden_T, cell_T = lstm_cell_rollout(
        xs, hidden0, cell0, w_gate, b_gate, w_out, b_out)
    jax.block_until_ready((log_probs, hidden_T, cell_T))

    # pure-JAX reference: apply the module's forward step by step
    h_r, c_r = hidden0, cell0
    outs = []
    for t in range(seq_len):
        comb = jnp.concatenate([xs[t], h_r], axis=1)
        g = comb @ w_gate + b_gate
        gate = jax.nn.sigmoid(g)        # f == i == o
        z = jnp.tanh(g)
        c_r = c_r * gate + z * gate
        h_r = jnp.tanh(c_r) * gate
        outs.append(jax.nn.log_softmax(h_r @ w_out + b_out, axis=1))
    outs_r = jnp.stack(outs)

    assert jnp.allclose(cell_T, c_r, atol=1e-4, rtol=1e-4)
    assert jnp.allclose(hidden_T, h_r, atol=1e-4, rtol=1e-4)
    assert jnp.allclose(log_probs, outs_r, atol=1e-4, rtol=1e-4)

    # single-step interface (the module's exact forward signature) also works
    lp1, h1, c1 = lstm_cell_forward(xs[0], hidden0, cell0,
                                    w_gate, b_gate, w_out, b_out)
    jax.block_until_ready((lp1, h1, c1))
    assert jnp.allclose(lp1, outs_r[0], atol=1e-4, rtol=1e-4)

    print("KERNEL_OK")
</pallas_src>

<mosaic_0001>
module attributes {stable_mosaic.version = 11 : i64} {
  func.func @lstm_seq_kernel(%arg0: i32, %arg1: memref<1x32x10xf32, #tpu.memory_space<vmem>>, %arg2: memref<32x128xf32, #tpu.memory_space<vmem>>, %arg3: memref<32x128xf32, #tpu.memory_space<vmem>>, %arg4: memref<10x128xf32, #tpu.memory_space<vmem>>, %arg5: memref<128x128xf32, #tpu.memory_space<vmem>>, %arg6: memref<1x128xf32, #tpu.memory_space<vmem>>, %arg7: memref<128x128xf32, #tpu.memory_space<vmem>>, %arg8: memref<1x128xf32, #tpu.memory_space<vmem>>, %arg9: memref<1x32x128xf32, #tpu.memory_space<vmem>>, %arg10: memref<32x128xf32, #tpu.memory_space<vmem>>, %arg11: memref<32x128xf32, #tpu.memory_space<vmem>>, %arg12: memref<32x128xf32, #tpu.memory_space<vmem>>, %arg13: memref<32x128xf32, #tpu.memory_space<vmem>>) attributes {dimension_semantics = [#tpu.dimension_semantics<arbitrary>], iteration_bounds = array<i64: 8>, scalar_prefetch = 0 : i64, scratch_operands = 2 : i64, tpu.core_type = #tpu.core_type<tc>, window_params = [{transform_indices = @transform_0, window_bounds = array<i64: 1, 32, 10>}, {pipeline_mode = #tpu.pipeline_mode<synchronous>, transform_indices = @transform_1, window_bounds = array<i64: 32, 128>}, {pipeline_mode = #tpu.pipeline_mode<synchronous>, transform_indices = @transform_2, window_bounds = array<i64: 32, 128>}, {pipeline_mode = #tpu.pipeline_mode<synchronous>, transform_indices = @transform_3, window_bounds = array<i64: 10, 128>}, {pipeline_mode = #tpu.pipeline_mode<synchronous>, transform_indices = @transform_4, window_bounds = array<i64: 128, 128>}, {pipeline_mode = #tpu.pipeline_mode<synchronous>, transform_indices = @transform_5, window_bounds = array<i64: 1, 128>}, {pipeline_mode = #tpu.pipeline_mode<synchronous>, transform_indices = @transform_6, window_bounds = array<i64: 128, 128>}, {pipeline_mode = #tpu.pipeline_mode<synchronous>, transform_indices = @transform_7, window_bounds = array<i64: 1, 128>}, {transform_indices = @transform_8, window_bounds = array<i64: 1, 32, 128>}, {pipeline_mode = #tpu.pipeline_mode<synchronous>, transform_indices = @transform_9, window_bounds = array<i64: 32, 128>}, {pipeline_mode = #tpu.pipeline_mode<synchronous>, transform_indices = @transform_10, window_bounds = array<i64: 32, 128>}]} {
    %c0_i32 = arith.constant 0 : i32
    %0 = arith.cmpi eq, %arg0, %c0_i32 : i32
    %1 = arith.extui %0 : i1 to i32
    %c0_i32_0 = arith.constant 0 : i32
    %2 = arith.cmpi ne, %1, %c0_i32_0 : i32
    scf.if %2 {
      %c0_30 = arith.constant 0 : index
      %c0_31 = arith.constant 0 : index
      %50 = vector.load %arg2[%c0_30, %c0_31] : memref<32x128xf32, #tpu.memory_space<vmem>>, vector<32x128xf32>
      %c0_32 = arith.constant 0 : index
      %c0_33 = arith.constant 0 : index
      %51 = vector.load %arg12[%c0_32, %c0_33] : memref<32x128xf32, #tpu.memory_space<vmem>>, vector<32x128xf32>
      tpu.vector_store %arg12[%c0_32, %c0_33], %50 {strides = array<i32>} : memref<32x128xf32, #tpu.memory_space<vmem>>, vector<32x128xf32>,
      %c0_34 = arith.constant 0 : index
      %c0_35 = arith.constant 0 : index
      %52 = vector.load %arg3[%c0_34, %c0_35] : memref<32x128xf32, #tpu.memory_space<vmem>>, vector<32x128xf32>
      %c0_36 = arith.constant 0 : index
      %c0_37 = arith.constant 0 : index
      %53 = vector.load %arg13[%c0_36, %c0_37] : memref<32x128xf32, #tpu.memory_space<vmem>>, vector<32x128xf32>
      tpu.vector_store %arg13[%c0_36, %c0_37], %52 {strides = array<i32>} : memref<32x128xf32, #tpu.memory_space<vmem>>, vector<32x128xf32>,
    } else {
    }
    %c0 = arith.constant 0 : index
    %c0_1 = arith.constant 0 : index
    %c0_2 = arith.constant 0 : index
    %3 = vector.load %arg1[%c0, %c0_1, %c0_2] : memref<1x32x10xf32, #tpu.memory_space<vmem>>, vector<1x32x10xf32>
    %4 = vector.shape_cast %3 : vector<1x32x10xf32> to vector<32x10xf32>
    %c0_3 = arith.constant 0 : index
    %c0_4 = arith.constant 0 : index
    %5 = vector.load %arg12[%c0_3, %c0_4] : memref<32x128xf32, #tpu.memory_space<vmem>>, vector<32x128xf32>
    %c0_5 = arith.constant 0 : index
    %c0_6 = arith.constant 0 : index
    %6 = vector.load %arg13[%c0_5, %c0_6] : memref<32x128xf32, #tpu.memory_space<vmem>>, vector<32x128xf32>
    %c0_7 = arith.constant 0 : index
    %c0_8 = arith.constant 0 : index
    %7 = vector.load %arg4[%c0_7, %c0_8] : memref<10x128xf32, #tpu.memory_space<vmem>>, vector<10x128xf32>
    %cst = arith.constant dense<0.000000e+00> : vector<32x128xf32>
    %8 = tpu.matmul %4, %7, %cst {dimension_numbers = #tpu.dot_dimension_numbers<[1], [0], [0], [1], [0, 0, 1, 1], [], []>} : vector<32x10xf32>, vector<10x128xf32>, vector<32x128xf32> -> vector<32x128xf32>
    %c0_9 = arith.constant 0 : index
    %c0_10 = arith.constant 0 : index
    %9 = vector.load %arg5[%c0_9, %c0_10] : memref<128x128xf32, #tpu.memory_space<vmem>>, vector<128x128xf32>
    %cst_11 = arith.constant dense<0.000000e+00> : vector<32x128xf32>
    %10 = tpu.matmul %5, %9, %cst_11 {dimension_numbers = #tpu.dot_dimension_numbers<[1], [0], [0], [1], [0, 0, 1, 1], [], []>} : vector<32x128xf32>, vector<128x128xf32>, vector<32x128xf32> -> vector<32x128xf32>
    %11 = arith.addf %8, %10 : vector<32x128xf32>
    %c0_12 = arith.constant 0 : index
    %c0_13 = arith.constant 0 : index
    %12 = vector.load %arg6[%c0_12, %c0_13] : memref<1x128xf32, #tpu.memory_space<vmem>>, vector<1x128xf32>
    %13 = vector.broadcast %12 : vector<1x128xf32> to vector<32x128xf32>
    %14 = arith.addf %11, %13 : vector<32x128xf32>
    %15 = arith.negf %14 : vector<32x128xf32>
    %16 = math.exp %15 : vector<32x128xf32>
    %cst_14 = arith.constant 1.000000e+00 : f32
    %17 = vector.broadcast %cst_14 : f32 to vector<32x128xf32>
    %18 = arith.addf %17, %16 : vector<32x128xf32>
    %19 = arith.divf %17, %18 : vector<32x128xf32>
    %20 = math.tanh %14 : vector<32x128xf32>
    %21 = arith.mulf %6, %19 : vector<32x128xf32>
    %22 = arith.mulf %20, %19 : vector<32x128xf32>
    %23 = arith.addf %21, %22 : vector<32x128xf32>
    %24 = math.tanh %23 : vector<32x128xf32>
    %25 = arith.mulf %24, %19 : vector<32x128xf32>
    %c0_15 = arith.constant 0 : index
    %c0_16 = arith.constant 0 : index
    %26 = vector.load %arg7[%c0_15, %c0_16] : memref<128x128xf32, #tpu.memory_space<vmem>>, vector<128x128xf32>
    %cst_17 = arith.constant dense<0.000000e+00> : vector<32x128xf32>
    %27 = tpu.matmul %25, %26, %cst_17 {dimension_numbers = #tpu.dot_dimension_numbers<[1], [0], [0], [1], [0, 0, 1, 1], [], []>} : vector<32x128xf32>, vector<128x128xf32>, vector<32x128xf32> -> vector<32x128xf32>
    %c0_18 = arith.constant 0 : index
    %c0_19 = arith.constant 0 : index
    %28 = vector.load %arg8[%c0_18, %c0_19] : memref<1x128xf32, #tpu.memory_space<vmem>>, vector<1x128xf32>
    %29 = vector.broadcast %28 : vector<1x128xf32> to vector<32x128xf32>
    %30 = arith.addf %27, %29 : vector<32x128xf32>
    %cst_20 = arith.constant dense<0xFF800000> : vector<32xf32>
    %31 = vector.multi_reduction <maximumf>, %30, %cst_20 [1] : vector<32x128xf32> to vector<32xf32>
    %32 = vector.shape_cast %31 : vector<32xf32> to vector<32x1xf32>
    %33 = vector.broadcast %32 : vector<32x1xf32> to vector<32x128xf32>
    %34 = arith.subf %30, %33 : vector<32x128xf32>
    %35 = math.exp %34 : vector<32x128xf32>
    %cst_21 = arith.constant dense<0.000000e+00> : vector<32xf32>
    %36 = vector.multi_reduction <add>, %35, %cst_21 [1] : vector<32x128xf32> to vector<32xf32>
    %37 = vector.shape_cast %36 : vector<32xf32> to vector<32x1xf32>
    %38 = math.log %37 : vector<32x1xf32>
    %39 = arith.addf %32, %38 : vector<32x1xf32>
    %40 = vector.broadcast %39 : vector<32x1xf32> to vector<32x128xf32>
    %41 = arith.subf %30, %40 : vector<32x128xf32>
    %c0_22 = arith.constant 0 : index
    %c0_23 = arith.constant 0 : index
    %c0_24 = arith.constant 0 : index
    %42 = vector.load %arg9[%c0_22, %c0_23, %c0_24] : memref<1x32x128xf32, #tpu.memory_space<vmem>>, vector<1x32x128xf32>
    %43 = vector.shape_cast %42 : vector<1x32x128xf32> to vector<32x128xf32>
    %44 = vector.shape_cast %41 : vector<32x128xf32> to vector<1x32x128xf32>
    tpu.vector_store %arg9[%c0_22, %c0_23, %c0_24], %44 {strides = array<i32>} : memref<1x32x128xf32, #tpu.memory_space<vmem>>, vector<1x32x128xf32>,
    %c0_25 = arith.constant 0 : index
    %c0_26 = arith.constant 0 : index
    %45 = vector.load %arg12[%c0_25, %c0_26] : memref<32x128xf32, #tpu.memory_space<vmem>>, vector<32x128xf32>
    tpu.vector_store %arg12[%c0_25, %c0_26], %25 {strides = array<i32>} : memref<32x128xf32, #tpu.memory_space<vmem>>, vector<32x128xf32>,
    %c0_27 = arith.constant 0 : index
    %c0_28 = arith.constant 0 : index
    %46 = vector.load %arg13[%c0_27, %c0_28] : memref<32x128xf32, #tpu.memory_space<vmem>>, vector<32x128xf32>
    tpu.vector_store %arg13[%c0_27, %c0_28], %23 {strides = array<i32>} : memref<32x128xf32, #tpu.memory_space<vmem>>, vector<32x128xf32>,
    %c7_i32 = arith.constant 7 : i32
    %47 = arith.cmpi eq, %arg0, %c7_i32 : i32
    %48 = arith.extui %47 : i1 to i32
    %c0_i32_29 = arith.constant 0 : i32
    %49 = arith.cmpi ne, %48, %c0_i32_29 : i32
    scf.if %49 {
      %c0_30 = arith.constant 0 : index
      %c0_31 = arith.constant 0 : index
      %50 = vector.load %arg10[%c0_30, %c0_31] : memref<32x128xf32, #tpu.memory_space<vmem>>, vector<32x128xf32>
      tpu.vector_store %arg10[%c0_30, %c0_31], %25 {strides = array<i32>} : memref<32x128xf32, #tpu.memory_space<vmem>>, vector<32x128xf32>,
      %c0_32 = arith.constant 0 : index
      %c0_33 = arith.constant 0 : index
      %51 = vector.load %arg11[%c0_32, %c0_33] : memref<32x128xf32, #tpu.memory_space<vmem>>, vector<32x128xf32>
      tpu.vector_store %arg11[%c0_32, %c0_33], %23 {strides = array<i32>} : memref<32x128xf32, #tpu.memory_space<vmem>>, vector<32x128xf32>,
    } else {
    }
    return
  }
  func.func @transform_0(%arg0: i32) -> (i32, i32, i32) {
    %c0_i32 = arith.constant 0 : i32
    %c0_i32_0 = arith.constant 0 : i32
    %c0_i32_1 = arith.constant 0 : i32
    return %arg0, %c0_i32, %c0_i32_0 : i32, i32, i32
  }
  func.func @transform_1(%arg0: i32) -> (i32, i32) {
    %c0_i32 = arith.constant 0 : i32
    %c0_i32_0 = arith.constant 0 : i32
    %c0_i32_1 = arith.constant 0 : i32
    return %c0_i32, %c0_i32_0 : i32, i32
  }
  func.func @transform_2(%arg0: i32) -> (i32, i32) {
    %c0_i32 = arith.constant 0 : i32
    %c0_i32_0 = arith.constant 0 : i32
    %c0_i32_1 = arith.constant 0 : i32
    return %c0_i32, %c0_i32_0 : i32, i32
  }
  func.func @transform_3(%arg0: i32) -> (i32, i32) {
    %c0_i32 = arith.constant 0 : i32
    %c0_i32_0 = arith.constant 0 : i32
    %c0_i32_1 = arith.constant 0 : i32
    return %c0_i32, %c0_i32_0 : i32, i32
  }
  func.func @transform_4(%arg0: i32) -> (i32, i32) {
    %c0_i32 = arith.constant 0 : i32
    %c0_i32_0 = arith.constant 0 : i32
    %c0_i32_1 = arith.constant 0 : i32
    return %c0_i32, %c0_i32_0 : i32, i32
  }
  func.func @transform_5(%arg0: i32) -> (i32, i32) {
    %c0_i32 = arith.constant 0 : i32
    %c0_i32_0 = arith.constant 0 : i32
    %c0_i32_1 = arith.constant 0 : i32
    return %c0_i32, %c0_i32_0 : i32, i32
  }
  func.func @transform_6(%arg0: i32) -> (i32, i32) {
    %c0_i32 = arith.constant 0 : i32
    %c0_i32_0 = arith.constant 0 : i32
    %c0_i32_1 = arith.constant 0 : i32
    return %c0_i32, %c0_i32_0 : i32, i32
  }
  func.func @transform_7(%arg0: i32) -> (i32, i32) {
    %c0_i32 = arith.constant 0 : i32
    %c0_i32_0 = arith.constant 0 : i32
    %c0_i32_1 = arith.constant 0 : i32
    return %c0_i32, %c0_i32_0 : i32, i32
  }
  func.func @transform_8(%arg0: i32) -> (i32, i32, i32) {
    %c0_i32 = arith.constant 0 : i32
    %c0_i32_0 = arith.constant 0 : i32
    %c0_i32_1 = arith.constant 0 : i32
    return %arg0, %c0_i32, %c0_i32_0 : i32, i32, i32
  }
  func.func @transform_9(%arg0: i32) -> (i32, i32) {
    %c0_i32 = arith.constant 0 : i32
    %c0_i32_0 = arith.constant 0 : i32
    %c0_i32_1 = arith.constant 0 : i32
    return %c0_i32, %c0_i32_0 : i32, i32
  }
  func.func @transform_10(%arg0: i32) -> (i32, i32) {
    %c0_i32 = arith.constant 0 : i32
    %c0_i32_0 = arith.constant 0 : i32
    %c0_i32_1 = arith.constant 0 : i32
    return %c0_i32, %c0_i32_0 : i32, i32
  }
}

</mosaic_0001>

<bundles_post_ra>
// kernel: tpu_custom_call.1
= control target key start
LH: loop header
LB: loop body
LE: loop exit
PB: predicated region body
PF: predicated region fallthrough
CT: control target
= control target key end

     0   :  { %s1715_s0 = inlined_call_operand.vmem [shape: f32[8,32,10], index: 0, kind: input, shape index: {}]   ;;  %s1716_s1 = inlined_call_operand.vmem [shape: f32[32,128], index: 1, kind: input, shape index: {}]   ;;  %s1717_s2 = inlined_call_operand.vmem [shape: f32[32,128], index: 2, kind: input, shape index: {}]   ;;  %s1718_s3 = inlined_call_operand.vmem [shape: f32[10,128], index: 3, kind: input, shape index: {}]   ;;  %s1719_s4 = inlined_call_operand.vmem [shape: f32[128,128], index: 4, kind: input, shape index: {}]   ;;  %s1720_s5 = inlined_call_operand.vmem [shape: f32[1,128], index: 5, kind: input, shape index: {}]   ;;  %s1721_s6 = inlined_call_operand.vmem [shape: f32[128,128], index: 6, kind: input, shape index: {}]   ;;  %s1722_s7 = inlined_call_operand.vmem [shape: f32[1,128], index: 7, kind: input, shape index: {}]   ;;  %s1723_s8 = inlined_call_operand.hbm [shape: f32[8,32,128], index: 8, kind: output, shape index: {0}]   ;;  %s1724_s9 = inlined_call_operand.hbm [shape: f32[32,128], index: 9, kind: output, shape index: {1}]   ;;  %s1725_s10 = inlined_call_operand.hbm [shape: f32[32,128], index: 10, kind: output, shape index: {2}]  }
   0x1   :  { %1727 = sst [smem:[#allocation12_spill]] %s1715_s0 }
   0x2   :  { %1728 = sst [smem:[#allocation13_spill]] %s1716_s1 }
   0x3   :  { %1729 = sst [smem:[#allocation14_spill]] %s1717_s2 }
   0x4   :  { %16 = vsyncpa [#allocation5], 0 }
   0x5   :  { %18 = vsyncpa [#allocation5 + $0x1], 0 }
   0x6   :  { %19 = vsyncpa [#allocation7], 0  ;;  %s1389_s13 = smov 0   ;;  %s1391_s14 = smov 0  }
   0x7   :  { %s1393_s15 = smov 0   ;;  %s1395_s16 = smov 0  }
   0x8 LB: > { %s1410_s17 = sadd.s32 4294967295, %s1327_s16   ;;  %s949_s18 = sadd.s32 4294967294, %s1327_s16   ;;  %s1327_s16 = sphi %s1395_s16, %s1741_s16   ;;  %s1323_s15 = sphi %s1393_s15, %s1740_s15   ;;  %s1319_s14 = sphi %s1391_s14, %s1739_s14   ;;  %s1315_s13 = sphi %s1389_s13, %s1738_s13  }
   0x9   : > { %s1414_s19 = sadd.s32 1, %s1327_s16   ;;  %s205_s20 = sadd.s32 1, %s1323_s15 }
   0xa   : > { %s202_s21 = ssub.s32 %s1327_s16, %s1414_s19  ;;  %p215_p0 = scmp.ne.s32.totalorder %s1323_s15, %s1319_s14 }
   0xb   : > { %p203_p1 = scmp.eq.s32.totalorder %s202_s21, 0  ;;  %p216_p2 = scmp.eq.s32.totalorder %s1410_s17, 7 }
   0xc   : > { %p221_p3 = scmp.ne.s32.totalorder %s1319_s14, %s1315_s13  ;;  %p222_p4 = scmp.eq.s32.totalorder %s949_s18, 7 }
   0xd   : > { %s1425_s22 = scalar_select %p203_p1, %s1323_s15, %s205_s20  }
   0xe   : > { %p1429_p5 = por %p216_p2, %p215_p0  ;;  %p1433_p6 = por %p222_p4, %p221_p3 }
   0xf   : > { %1730 = sst [smem:[#allocation11_spill]] %s1425_s22  ;;  %p952_p7 = scmp.ge.s32.totalorder %s1327_s16, 1 }
  0x10   : > { %p311_p8 = scmp.lt.s32.totalorder %s1327_s16, 9 }
  0x12   : > { %p312_p9 = pnand %p952_p7, %p311_p8 }
  0x13   : > { %s1726_s25 = sand.u32 (!%p312_p9), 1, %s1319_s14   ;;  %p349_p10 = scmp.lt.s32.totalorder (!%p312_p9), %s1410_s17, 7 }
  0x14   : > { %315 = sbr.rel (%p312_p9) target bundleno = 898 (0x382), region = 52  ;;  %s953_s26 = sshll.u32 (!%p312_p9), %s1726_s25, 5 }
  0x15   : > { %s1733_s0 = sld [smem:[#allocation12_spill]] (!%p312_p9)  ;;  %s1449_s12 = scalar_lea.vmem (!%p312_p9), [#allocation4], %s953_s26 }
  0x16   : > { %p956_p11 = scmp.ne.s32.totalorder (!%p312_p9), %s1410_s17, 0 }
  0x19   : > { %s350_s27 = scalar_select %p349_p10, %s1410_s17, 7 }
  0x1a   : > { %357 = sbr.rel (%p956_p11) target bundleno = 37 (0x25), region = 56  ;;  %s1734_s1 = sld [smem:[#allocation13_spill]] (!%p956_p11) }
  0x1b   : > { %s978_s28 = sshll.u32 %s350_s27, 5  ;;  %s1735_s2 = sld [smem:[#allocation14_spill]] (!%p956_p11) }
  0x1c   : > { %s1447_s11 = scalar_lea.vmem %s1733_s0, %s978_s28 }
  0x20   : > { %v358_v0 = vld [vmem:[%s1734_s1] sm:$0xff]  ;;  %v359_v1 = vld [vmem:[%s1734_s1 + $0x8] sm:$0xff]  ;;  %v360_v2 = vld [vmem:[%s1734_s1 + $0x10] sm:$0xff] }
  0x21   : > { %362 = vst [vmem:[#allocation2 + $0x10] sm:$0xff] %v358_v0  ;;  %363 = vst [vmem:[#allocation2] sm:$0xff] %v359_v1  ;;  %v361_v3 = vld [vmem:[%s1734_s1 + $0x18] sm:$0xff]  ;;  %v366_v4 = vld [vmem:[%s1735_s2] sm:$0xff] }
  0x22   : > { %364 = vst [vmem:[#allocation2 + $0x18] sm:$0xff] %v360_v2  ;;  %v367_v5 = vld [vmem:[%s1735_s2 + $0x8] sm:$0xff]  ;;  %365 = vst [vmem:[#allocation2 + $0x8] sm:$0xff] %v361_v3  ;;  %v368_v6 = vld [vmem:[%s1735_s2 + $0x10] sm:$0xff] }
  0x23   : > { %370 = vst [vmem:[#allocation3] sm:$0xff] %v366_v4  ;;  %371 = vst [vmem:[#allocation3 + $0x18] sm:$0xff] %v367_v5  ;;  %v369_v7 = vld [vmem:[%s1735_s2 + $0x18] sm:$0xff] }
  0x24   : > { %372 = vst [vmem:[#allocation3 + $0x8] sm:$0xff] %v368_v6  ;;  %373 = vst [vmem:[#allocation3 + $0x10] sm:$0xff] %v369_v7 }
  0x25 PF: > { %v403_v8 = vld [vmem:[%s1719_s4 + $0x78] sm:$0xff]  ;;  %v402_v9 = vld [vmem:[%s1719_s4 + $0x70] sm:$0xff]  ;;  %v401_v10 = vld [vmem:[%s1719_s4 + $0x68] sm:$0xff]  ;;  %vm502_vm0 = vcmask 1041408   ;;  %vm489_vm1 = vcmask 80896   ;;  %p968_p12 = scmp.ne.s32.totalorder %s1410_s17, 7 }
  0x26   : > { %1026 = vmatprep.subr.mxu0 %v403_v8  ;;  %v400_v11 = vld [vmem:[%s1719_s4 + $0x60] sm:$0xff]  ;;  %v387_v12 = vld [vmem:[%s1718_s3 + $0x8] sm:$0x3]  ;;  %v399_v14 = vld [vmem:[%s1719_s4 + $0x58] sm:$0xff] }
  0x27   : > { %1027 = vmatpush3.msra.mxu0 %v403_v8  ;;  %1064 = vmatprep.subr.msk.mxu1 %vm502_vm0, %v387_v12  ;;  %v386_v13 = vld [vmem:[%s1718_s3] sm:$0xff]  ;;  %v375_v16 = vld [vmem:[%s1447_s11 + $0x8] sm:$0xff]  ;;  %v398_v17 = vld [vmem:[%s1719_s4 + $0x50] sm:$0xff] }
  0x28   : > { %1028 = vmatprep.subr.mxu0 %v402_v9  ;;  %1065 = vmatpush3.msk.msra.mxu1 %vm502_vm0, %v387_v12  ;;  %v374_v15 = vld [vmem:[%s1447_s11] sm:$0xff]  ;;  %v378_v18 = vld [vmem:[#allocation2 + $0x10] sm:$0xff]  ;;  %v397_v20 = vld [vmem:[%s1719_s4 + $0x48] sm:$0xff] }
  0x29   : > { %1029 = vmatpush3.msra.mxu0 %v402_v9  ;;  %1066 = vmatprep.subr.mxu1 %v386_v13  ;;  %v376_v19 = vld [vmem:[%s1447_s11 + $0x10] sm:$0xff]  ;;  %v377_v21 = vld [vmem:[%s1447_s11 + $0x18] sm:$0xff]  ;;  %v396_v22 = vld [vmem:[%s1719_s4 + $0x40] sm:$0xff] }
  0x2a   : > { %1030 = vmatprep.subr.mxu0 %v401_v10  ;;  %1067 = vmatpush3.msra.mxu1 %v386_v13  ;;  %v395_v23 = vld [vmem:[%s1719_s4 + $0x38] sm:$0xff]  ;;  %v394_v24 = vld [vmem:[%s1719_s4 + $0x30] sm:$0xff]  ;;  %v393_v25 = vld [vmem:[%s1719_s4 + $0x28] sm:$0xff] }
  0x2b   : > { %1031 = vmatpush3.msra.mxu0 %v401_v10  ;;  %1068 = vmatprep.mubr.msk.f32.mxu1 %vm489_vm1, %v374_v15  ;;  %v392_v26 = vld [vmem:[%s1719_s4 + $0x20] sm:$0xff]  ;;  %v391_v27 = vld [vmem:[%s1719_s4 + $0x18] sm:$0xff]  ;;  %v390_v28 = vld [vmem:[%s1719_s4 + $0x10] sm:$0xff] }
  0x2c   : > { %1032 = vmatprep.subr.mxu0 %v400_v11  ;;  %1069 = vmatmul.mubr.msk.f32.vlgmr.msra.gmra.mxu1 %vm489_vm1, %v375_v16  ;;  %v389_v29 = vld [vmem:[%s1719_s4 + $0x8] sm:$0xff]  ;;  %v388_v30 = vld [vmem:[%s1719_s4] sm:$0xff]  ;;  %v380_v32 = vld [vmem:[#allocation2 + $0x18] sm:$0xff] }
  0x2d   : > { %1033 = vmatpush3.msra.mxu0 %v400_v11  ;;  %1058 = vmatprep.mubr.f32.mxu0 %v378_v18  ;;  %v379_v31 = vld [vmem:[#allocation2] sm:$0xff]  ;;  %v381_v33 = vld [vmem:[#allocation2 + $0x8] sm:$0xff]  ;;  %v665_v34 = vld [vmem:[%s1721_s6 + $0x78] sm:$0xff] }
  0x2e   : > { %1034 = vmatprep.subr.mxu0 %v399_v14  ;;  %1071 = vmatprep.mubr.msk.f32.mxu1 %vm489_vm1, %v376_v19  ;;  %v664_v35 = vld [vmem:[%s1721_s6 + $0x70] sm:$0xff]  ;;  %v663_v36 = vld [vmem:[%s1721_s6 + $0x68] sm:$0xff]  ;;  %v662_v37 = vld [vmem:[%s1721_s6 + $0x60] sm:$0xff] }
  0x2f   : > { %1035 = vmatpush3.msra.mxu0 %v399_v14  ;;  %1074 = vmatprep.subr.mxu1 %v665_v34  ;;  %v661_v38 = vld [vmem:[%s1721_s6 + $0x58] sm:$0xff]  ;;  %v660_v39 = vld [vmem:[%s1721_s6 + $0x50] sm:$0xff]  ;;  %v659_v40 = vld [vmem:[%s1721_s6 + $0x48] sm:$0xff] }
  0x30   : > { %1036 = vmatprep.subr.mxu0 %v398_v17  ;;  %1072 = vmatmul.mubr.msk.f32.gmra.mxu1 %vm489_vm1, %v377_v21  ;;  %v658_v41 = vld [vmem:[%s1721_s6 + $0x40] sm:$0xff]  ;;  %v657_v42 = vld [vmem:[%s1721_s6 + $0x38] sm:$0xff]  ;;  %v656_v43 = vld [vmem:[%s1721_s6 + $0x30] sm:$0xff] }
  0x31   : > { %1037 = vmatpush3.msra.mxu0 %v398_v17  ;;  %1075 = vmatpush3.msra.mxu1 %v665_v34  ;;  %v655_v44 = vld [vmem:[%s1721_s6 + $0x28] sm:$0xff]  ;;  %v654_v45 = vld [vmem:[%s1721_s6 + $0x20] sm:$0xff]  ;;  %v653_v46 = vld [vmem:[%s1721_s6 + $0x18] sm:$0xff] }
  0x32   : > { %1038 = vmatprep.subr.mxu0 %v397_v20  ;;  %1076 = vmatprep.subr.mxu1 %v664_v35  ;;  %v652_v47 = vld [vmem:[%s1721_s6 + $0x10] sm:$0xff]  ;;  %v651_v48 = vld [vmem:[%s1721_s6 + $0x8] sm:$0xff]  ;;  %v650_v49 = vld [vmem:[%s1721_s6] sm:$0xff] }
  0x33   : > { %1039 = vmatpush3.msra.mxu0 %v397_v20  ;;  %1077 = vmatpush3.msra.mxu1 %v664_v35  ;;  %v962_v53 = vld [vmem:[%s1720_s5] ss:$0 sm:$0xff]  ;;  %v383_v15 = vld [vmem:[#allocation3 + $0x18] sm:$0xff] }
  0x34   : > { %1040 = vmatprep.subr.mxu0 %v396_v22  ;;  %1078 = vmatprep.subr.mxu1 %v663_v36  ;;  %v382_v18 = vld [vmem:[#allocation3] sm:$0xff] }
  0x35   : > { %1041 = vmatpush3.msra.mxu0 %v396_v22  ;;  %1079 = vmatpush3.msra.mxu1 %v663_v36 }
  0x36   : > { %1042 = vmatprep.subr.mxu0 %v395_v23  ;;  %1080 = vmatprep.subr.mxu1 %v662_v37 }
  0x37   : > { %1043 = vmatpush3.msra.mxu0 %v395_v23  ;;  %1081 = vmatpush3.msra.mxu1 %v662_v37  ;;  %v385_v23 = vld [vmem:[#allocation3 + $0x10] sm:$0xff] }
  0x38   : > { %1044 = vmatprep.subr.mxu0 %v394_v24  ;;  %1082 = vmatprep.subr.mxu1 %v661_v38 }
  0x39   : > { %1045 = vmatpush3.msra.mxu0 %v394_v24  ;;  %1083 = vmatpush3.msra.mxu1 %v661_v38 }
  0x3a   : > { %1046 = vmatprep.subr.mxu0 %v393_v25  ;;  %1084 = vmatprep.subr.mxu1 %v660_v39 }
  0x3b   : > { %1047 = vmatpush3.msra.mxu0 %v393_v25  ;;  %1085 = vmatpush3.msra.mxu1 %v660_v39 }
  0x3c   : > { %1048 = vmatprep.subr.mxu0 %v392_v26  ;;  %1086 = vmatprep.subr.mxu1 %v659_v40 }
  0x3d   : > { %1049 = vmatpush3.msra.mxu0 %v392_v26  ;;  %1087 = vmatpush3.msra.mxu1 %v659_v40 }
  0x3e   : > { %1050 = vmatprep.subr.mxu0 %v391_v27  ;;  %1088 = vmatprep.subr.mxu1 %v658_v41 }
  0x3f   : > { %1051 = vmatpush3.msra.mxu0 %v391_v27  ;;  %1089 = vmatpush3.msra.mxu1 %v658_v41 }
  0x40   : > { %1052 = vmatprep.subr.mxu0 %v390_v28  ;;  %1090 = vmatprep.subr.mxu1 %v657_v42 }
  0x41   : > { %1053 = vmatpush3.msra.mxu0 %v390_v28  ;;  %1091 = vmatpush3.msra.mxu1 %v657_v42 }
  0x42   : > { %1054 = vmatprep.subr.mxu0 %v389_v29  ;;  %1092 = vmatprep.subr.mxu1 %v656_v43 }
  0x43   : > { %1055 = vmatpush3.msra.mxu0 %v389_v29  ;;  %1093 = vmatpush3.msra.mxu1 %v656_v43  ;;  %v384_v29 = vld [vmem:[#allocation3 + $0x8] sm:$0xff] }
  0x44   : > { %1056 = vmatprep.subr.mxu0 %v388_v30  ;;  %1094 = vmatprep.subr.mxu1 %v655_v44 }
  0x45   : > { %1057 = vmatpush3.msra.mxu0 %v388_v30  ;;  %1095 = vmatpush3.msra.mxu1 %v655_v44 }
  0x46   : > { %1059 = vmatmul.mubr.f32.vlgmr.msra.gmra.mxu0 %v379_v31  ;;  %1096 = vmatprep.subr.mxu1 %v654_v45 }
  0x47   : > { %1061 = vmatprep.mubr.f32.mxu0 %v380_v32  ;;  %1097 = vmatpush3.msra.mxu1 %v654_v45 }
  0x48   : > { %1098 = vmatprep.subr.mxu1 %v653_v46 }
  0x49   : > { %1099 = vmatpush3.msra.mxu1 %v653_v46 }
  0x4a   : > { %1062 = vmatmul.mubr.f32.gmra.mxu0 %v381_v33  ;;  %1100 = vmatprep.subr.mxu1 %v652_v47 }
  0x4b   : > { %1101 = vmatpush3.msra.mxu1 %v652_v47 }
  0x4c   : > { %1102 = vmatprep.subr.mxu1 %v651_v48 }
  0x4d   : > { %1103 = vmatpush3.msra.mxu1 %v651_v48  ;;  %v967_v48 = vld [vmem:[%s1722_s7] ss:$0 sm:$0xff] }
  0x4e   : > { %1104 = vmatprep.subr.mxu1 %v650_v49 }
  0x4f   : > { %1105 = vmatpush3.msra.mxu1 %v650_v49 }
  0xec   : > { %v1070_v50 = vpop.f32.mrf.mxu1 }
  0xee   : > { %v572_v51 = vpop.f32.mrf.mxu1 }
  0xf0   : > { %v1073_v56 = vpop.f32.mrf.mxu1 }
  0xf2   : > { %v582_v63 = vpop.f32.mrf.mxu1 }
 0x106   : > { %v1060_v52 = vpop.f32.mrf.mxu0 }
 0x107   : > { %v578_v54 = vadd.f32 %v1070_v50, %v1060_v52 }
 0x108   : > { %v470_v55 = vpop.f32.mrf.mxu0 }
 0x109   : > { %v599_v57 = vadd.f32 %v962_v53, %v578_v54  ;;  %v573_v58 = vadd.f32 %v572_v51, %v470_v55 }
 0x10a   : > { %v1063_v59 = vpop.f32.mrf.mxu0 }
 0x10b   : > { %v964_v60 = vmul.f32 -1.442695, %v599_v57  ;;  %v598_v61 = vadd.f32 %v962_v53, %v573_v58  ;;  %v588_v62 = vadd.f32 %v1073_v56, %v1063_v59 }
 0x10c   : > { %v480_v0 = vpop.f32.mrf.mxu0 }
 0x10d   : > { %1167 = vpow2.f32 %v964_v60  ;;  %v963_v1 = vmul.f32 -1.442695, %v598_v61  ;;  %v601_v2 = vadd.f32 %v962_v53, %v588_v62  ;;  %v583_v3 = vadd.f32 %v582_v63, %v480_v0 }
 0x10f   : > { %1169 = vpow2.f32 %v963_v1  ;;  %v966_v4 = vmul.f32 -1.442695, %v601_v2  ;;  %v600_v5 = vadd.f32 %v962_v53, %v583_v3 }
 0x111   : > { %1171 = vpow2.f32 %v966_v4  ;;  %v965_v6 = vmul.f32 -1.442695, %v600_v5 }
 0x113   : > { %1173 = vpow2.f32 %v965_v6 }
 0x114   : > { %1175 = vtanh.f32 %v599_v57 }
 0x11a   : > { %v1168_v7 = vpop.eup %1167 }
 0x11b   : > { %v615_v8 = vadd.f32 1.0, %v1168_v7 }
 0x11c   : > { %v1170_v9 = vpop.eup %1169 }
 0x11d   : > { %1177 = vrcp.f32 %v615_v8  ;;  %v614_v10 = vadd.f32 1.0, %v1170_v9 }
 0x11e   : > { %v1172_v11 = vpop.eup %1171  ;;  %1179 = vtanh.f32 %v598_v61 }
 0x11f   : > { %1181 = vrcp.f32 %v614_v10  ;;  %v617_v12 = vadd.f32 1.0, %v1172_v11 }
 0x120   : > { %v1174_v13 = vpop.eup %1173  ;;  %1183 = vtanh.f32 %v601_v2 }
 0x121   : > { %1185 = vrcp.f32 %v617_v12  ;;  %v616_v14 = vadd.f32 1.0, %v1174_v13  ;;  %v1176_v16 = vpop.eup %1175 }
 0x122   : > { %1187 = vtanh.f32 %v600_v5 }
 0x123   : > { %1189 = vrcp.f32 %v616_v14 }
 0x12a   : > { %v1178_v17 = vpop.eup %1177 }
 0x12b   : > { %v1180_v19 = vpop.eup %1179  ;;  %v631_v20 = vmul.f32 %v1178_v17, %v383_v15  ;;  %v635_v21 = vmul.f32 %v1178_v17, %v1176_v16 }
 0x12c   : > { %v1182_v22 = vpop.eup %1181 }
 0x12d   : > { %v1184_v24 = vpop.eup %1183  ;;  %v1589_v25 = vadd.f32 %v635_v21, %v631_v20  ;;  %v634_v26 = vmul.f32 %v1182_v22, %v1180_v19  ;;  %v630_v27 = vmul.f32 %v1182_v22, %v382_v18 }
 0x12e   : > { %v1186_v28 = vpop.eup %1185 }
 0x12f   : > { %v1188_v30 = vpop.eup %1187  ;;  %1191 = vtanh.f32 %v1589_v25  ;;  %811 = vst [vmem:[#allocation3 + $0x18] sm:$0xff] %v1589_v25  ;;  %v637_v31 = vmul.f32 %v1186_v28, %v1184_v24  ;;  %v1593_v32 = vadd.f32 %v634_v26, %v630_v27  ;;  %v633_v33 = vmul.f32 %v1186_v28, %v385_v23 }
 0x130   : > { %v1190_v34 = vpop.eup %1189 }
 0x131   : > { %v636_v35 = vmul.f32 %v1190_v34, %v1188_v30  ;;  %1193 = vtanh.f32 %v1593_v32  ;;  %810 = vst [vmem:[#allocation3] sm:$0xff] %v1593_v32  ;;  %v632_v36 = vmul.f32 %v1190_v34, %v384_v29  ;;  %v1597_v37 = vadd.f32 %v637_v31, %v633_v33 }
 0x133   : > { %v1599_v38 = vadd.f32 %v636_v35, %v632_v36  ;;  %1195 = vtanh.f32 %v1597_v37  ;;  %813 = vst [vmem:[#allocation3 + $0x10] sm:$0xff] %v1597_v37 }
 0x135   : > { %1197 = vtanh.f32 %v1599_v38  ;;  %812 = vst [vmem:[#allocation3 + $0x8] sm:$0xff] %v1599_v38 }
 0x13c   : > { %v1192_v39 = vpop.eup %1191 }
 0x13d   : > { %v1605_v40 = vmul.f32 %v1192_v39, %v1178_v17 }
 0x13e   : > { %v1194_v41 = vpop.eup %1193 }
 0x13f   : > { %v1607_v42 = vmul.f32 %v1194_v41, %v1182_v22  ;;  %807 = vst [vmem:[#allocation2] sm:$0xff] %v1605_v40 }
 0x140   : > { %v1196_v43 = vpop.eup %1195 }
 0x141   : > { %1106 = vmatprep.mubr.f32.mxu1 %v1607_v42  ;;  %806 = vst [vmem:[#allocation2 + $0x10] sm:$0xff] %v1607_v42  ;;  %v1612_v44 = vmul.f32 %v1196_v43, %v1186_v28 }
 0x142   : > { %v1198_v45 = vpop.eup %1197  ;;  %1107 = vmatmul.mubr.f32.vlgmr.msra.gmra.mxu1 %v1605_v40 }
 0x143   : > { %v1615_v46 = vmul.f32 %v1198_v45, %v1190_v34  ;;  %809 = vst [vmem:[#allocation2 + $0x8] sm:$0xff] %v1612_v44 }
 0x145   : > { %1109 = vmatprep.mubr.f32.mxu1 %v1615_v46  ;;  %808 = vst [vmem:[#allocation2 + $0x18] sm:$0xff] %v1615_v46 }
 0x146   : > { %1110 = vmatmul.mubr.f32.gmra.mxu1 %v1612_v44 }
 0x202   : > { %v1108_v47 = vpop.f32.mrf.mxu1 }
 0x203   : > { %v745_v53 = vadd.f32 %v1108_v47, %v967_v48 }
 0x204   : > { %v739_v49 = vpop.f32.mrf.mxu1 }
 0x205   : > { %v740_v50 = vadd.f32 %v967_v48, %v739_v49 }
 0x206   : > { %v1111_v51 = vpop.f32.mrf.mxu1 }
 0x207   : > { %758 = vmax.xlane.f32.xlu0 %v740_v50  ;;  %v755_v55 = vadd.f32 %v1111_v51, %v967_v48 }
 0x208   : > { %v749_v52 = vpop.f32.mrf.mxu1 }
 0x209   : > { %v750_v54 = vadd.f32 %v967_v48, %v749_v52 }
 0x20b   : > { %762 = vmax.xlane.f32.xlu1 %v750_v54  ;;  %760 = vmax.xlane.f32.xlu0 %v745_v53 }
 0x20f   : > { %764 = vmax.xlane.f32.xlu1 %v755_v55 }
 0x290   : > { %v759_v56 = vpop.xlane.xlu0 %758 }
 0x291   : > { %v766_v57 = vsub.f32 %v740_v50, %v759_v56 }
 0x293   : > { %v770_v58 = vmul.f32 1.442695, %v766_v57 }
 0x294   : > { %v763_v59 = vpop.xlane.xlu1 %762  ;;  %v761_v60 = vpop.xlane.xlu0 %760 }
 0x295   : > { %1199 = vpow2.f32 %v770_v58  ;;  %v768_v61 = vsub.f32 %v750_v54, %v763_v59  ;;  %v767_v62 = vsub.f32 %v745_v53, %v761_v60 }
 0x297   : > { %v774_v63 = vmul.f32 1.442695, %v768_v61  ;;  %v772_v0 = vmul.f32 1.442695, %v767_v62 }
 0x298   : > { %v765_v1 = vpop.xlane.xlu1 %764 }
 0x299   : > { %1201 = vpow2.f32 %v774_v63  ;;  %v769_v2 = vsub.f32 %v755_v55, %v765_v1 }
 0x29a   : > { %1203 = vpow2.f32 %v772_v0 }
 0x29b   : > { %v776_v3 = vmul.f32 1.442695, %v769_v2 }
 0x29d   : > { %1205 = vpow2.f32 %v776_v3 }
 0x2a2   : > { %v1200_v4 = vpop.eup %1199 }
 0x2a3   : > { %778 = vadd.xlane.f32.xlu0 %v1200_v4 }
 0x2a6   : > { %v1202_v5 = vpop.eup %1201 }
 0x2a7   : > { %v1204_v6 = vpop.eup %1203  ;;  %782 = vadd.xlane.f32.xlu0 %v1202_v5 }
 0x2a8   : > { %780 = vadd.xlane.f32.xlu1 %v1204_v6 }
 0x2aa   : > { %v1206_v7 = vpop.eup %1205 }
 0x2ac   : > { %784 = vadd.xlane.f32.xlu1 %v1206_v7 }
 0x32c   : > { %v779_v8 = vpop.xlane.xlu0 %778 }
 0x32d   : > { %1207 = vlog2.f32 %v779_v8 }
 0x330   : > { %v783_v9 = vpop.xlane.xlu0 %782 }
 0x331   : > { %v781_v10 = vpop.xlane.xlu1 %780  ;;  %1209 = vlog2.f32 %v783_v9 }
 0x332   : > { %1211 = vlog2.f32 %v781_v10 }
 0x335   : > { %v785_v11 = vpop.xlane.xlu1 %784 }
 0x336   : > { %1213 = vlog2.f32 %v785_v11 }
 0x33a   : > { %v1208_v12 = vpop.eup %1207 }
 0x33b   : > { %v787_v13 = vmul.f32 0.6931472, %v1208_v12 }
 0x33d   : > { %v794_v14 = vadd.f32 %v787_v13, %v759_v56 }
 0x33e   : > { %v1210_v15 = vpop.eup %1209 }
 0x33f   : > { %v1212_v16 = vpop.eup %1211  ;;  %v798_v17 = vsub.f32 %v740_v50, %v794_v14  ;;  %v791_v18 = vmul.f32 0.6931472, %v1210_v15 }
 0x340   : > { %v789_v19 = vmul.f32 0.6931472, %v1212_v16 }
 0x341   : > { %802 = vst [vmem:[%s1449_s12] sm:$0xff] %v798_v17  ;;  %v796_v20 = vadd.f32 %v791_v18, %v763_v59 }
 0x342   : > { %v795_v21 = vadd.f32 %v789_v19, %v761_v60 }
 0x343   : > { %v1214_v22 = vpop.eup %1213  ;;  %v800_v23 = vsub.f32 %v750_v54, %v796_v20 }
 0x344   : > { %v799_v24 = vsub.f32 %v745_v53, %v795_v21  ;;  %v793_v26 = vmul.f32 0.6931472, %v1214_v22 }
 0x345   : > { %804 = vst [vmem:[%s1449_s12 + $0x10] sm:$0xff] %v800_v23 }
 0x346   : > { %803 = vst [vmem:[%s1449_s12 + $0x8] sm:$0xff] %v799_v24  ;;  %v797_v27 = vadd.f32 %v793_v26, %v765_v1  ;;  %817 = sbr.rel (%p968_p12) target bundleno = 847 (0x34f), region = 60 }
 0x348   : > { %v801_v28 = vsub.f32 %v755_v55, %v797_v27 }
 0x34a   : > { %805 = vst [vmem:[%s1449_s12 + $0x18] sm:$0xff] %v801_v28 }
 0x34b   : > { %818 = vst [vmem:[#allocation6] sm:$0xff] %v1607_v42  ;;  %819 = vst [vmem:[#allocation6 + $0x8] sm:$0xff] %v1605_v40 }
 0x34c   : > { %820 = vst [vmem:[#allocation6 + $0x10] sm:$0xff] %v1615_v46  ;;  %821 = vst [vmem:[#allocation6 + $0x18] sm:$0xff] %v1612_v44 }
 0x34d   : > { %822 = vst [vmem:[#allocation8] sm:$0xff] %v1593_v32  ;;  %823 = vst [vmem:[#allocation8 + $0x8] sm:$0xff] %v1589_v25 }
 0x34e   : > { %824 = vst [vmem:[#allocation8 + $0x10] sm:$0xff] %v1599_v38  ;;  %825 = vst [vmem:[#allocation8 + $0x18] sm:$0xff] %v1597_v37 }
 0x34f PF: > { %s1329_s25 = smov [#allocation6]   ;;  %s979_s27 = sshll.u32 %s1410_s17, 9 }
 0x350   : > { %s853_s21 = sshll.u32 %s1329_s25, 4  ;;  %s1641_s29 = scalar_lea.hbm %s1723_s8, %s979_s27  ;;  %s854_s21 = int_to_ptr.vmem [resolvable:$true] %s853_s21 }
 0x351   : > { %s1215_s30 = scalar_lea.vmem %s854_s21, 512  ;;  %p1222_p3 = scmp.lt.s32.totalorder %s854_s21, %s854_s21 }
 0x352   : > { %p1216_p13 = scmp.ne.s32.totalorder %s854_s21, %s1215_s30  ;;  %p1223_p4 = scmp.lt.s32.totalorder %s1215_s30, %s1215_s30 }
 0x354   : > { %p1217_p0 = pnand %p1216_p13, %p216_p2  ;;  %p1224_p7 = por %p1223_p4, %p1222_p3 }
 0x356   : > { %p1218_p1 = pneg %p1217_p0 }
 0x358   : > { %p1225_p8 = pnand %p1224_p7, %p1218_p1 }
 0x35a   : > { %1228 = shalt.err (!%p1225_p8)
}
 0x35b   : > { %s1330_s11 = smov 128   ;;  %s1331_s18 = smov 8  }
 0x35c   : > { %1114 = dma.vmem_to_hbm [thread:$0]  (%p216_p2), %s854_s21, 512, %s1724_s9, [#allocation7], %s1330_s11, %s1330_s11, %s1331_s18  }
 0x35d   : > { %s840_s25 = sshll.u32 %s1449_s12, 4  ;;  %s1332_s27 = smov [#allocation8]   ;;  %s1654_s25 = int_to_ptr.vmem [resolvable:$true] %s840_s25 }
 0x35e   : > { %s1656_s26 = sshll.u32 %s1332_s27, 4  ;;  %s1736_s28 = sand.u32 1, %s1319_s14   ;;  %s867_s26 = int_to_ptr.vmem [resolvable:$true] %s1656_s26 }
 0x35f   : > { %s827_s30 = scalar_lea.sflag [#allocation5], %s1736_s28  ;;  %s1239_s0 = scalar_lea.vmem %s1654_s25, 512 }
 0x360   : > { %p1240_p9 = scmp.ne.s32.totalorder %s1654_s25, %s1239_s0  ;;  %s1333_s1 = smov [#allocation4]  }
 0x361   : > { %s1243_s2 = sshll.u32 %s1333_s1, 4  ;;  %s1244_s2 = int_to_ptr.vmem [resolvable:$false] %s1243_s2 }
 0x362   : > { %p1241_p10 = pnand %p1240_p9, %p1429_p5  ;;  %s1245_s21 = scalar_lea.vmem %s1244_s2, 1024 }
 0x363   : > { %p1246_p12 = scmp.lt.s32.totalorder %s1654_s25, %s1244_s2  ;;  %p1247_p13 = scmp.lt.s32.totalorder %s1245_s21, %s1239_s0 }
 0x364   : > { %p1242_p11 = pneg %p1241_p10 }
 0x365   : > { %p1248_p0 = por %p1247_p13, %p1246_p12 }
 0x367   : > { %p1249_p1 = pnand %p1248_p0, %p1242_p11 }
 0x369   : > { %1252 = shalt.err (!%p1249_p1)
}
 0x36a   : > { %s1253_s12 = scalar_lea.hbm %s1641_s29, 512  ;;  %s1257_s1 = scalar_lea.hbm %s1723_s8, 4096 }
 0x36b   : > { %p1254_p3 = scmp.ne.s32.totalorder %s1641_s29, %s1253_s12  ;;  %p1258_p8 = scmp.lt.s32.totalorder %s1641_s29, %s1723_s8 }
 0x36c   : > { %p1259_p9 = scmp.lt.s32.totalorder %s1257_s1, %s1253_s12 }
 0x36d   : > { %p1255_p4 = pnand %p1254_p3, %p1429_p5 }
 0x36e   : > { %p1260_p10 = por %p1259_p9, %p1258_p8 }
 0x36f   : > { %p1256_p7 = pneg %p1255_p4 }
 0x371   : > { %p1261_p11 = pnand %p1260_p10, %p1256_p7 }
 0x373   : > { %1264 = shalt.err (!%p1261_p11)
}
 0x374   : > { %1112 = dma.vmem_to_hbm [thread:$0]  (%p1429_p5), %s1654_s25, 512, %s1641_s29, %s827_s30, %s1330_s11, %s1330_s11, %s1331_s18  }
 0x375   : > { %s1265_s0 = scalar_lea.vmem %s867_s26, 512  ;;  %p1272_p1 = scmp.lt.s32.totalorder %s867_s26, %s867_s26 }
 0x376   : > { %p1266_p12 = scmp.ne.s32.totalorder %s867_s26, %s1265_s0  ;;  %p1273_p3 = scmp.lt.s32.totalorder %s1265_s0, %s1265_s0 }
 0x378   : > { %p1267_p13 = pnand %p1266_p12, %p216_p2  ;;  %p1274_p4 = por %p1273_p3, %p1272_p1 }
 0x37a   : > { %p1268_p0 = pneg %p1267_p13 }
 0x37c   : > { %p1275_p7 = pnand %p1274_p4, %p1268_p0 }
 0x37e   : > { %1278 = shalt.err (!%p1275_p7)
}
 0x37f   : > { %1116 = dma.vmem_to_hbm [thread:$0]  (%p216_p2), %s867_s26, 512, %s1725_s10, [#allocation7], %s1330_s11, %s1330_s11, %s1331_s18  }
 0x380   : > { %1306 = dma.done.wait (%p216_p2), [#allocation7], 1024  }
 0x381   : > { %1308 = vsyncadd (%p216_p2), [#allocation7], 4294966272 }
 0x382 PF: > { %p1130_p5 = scmp.ge.s32.totalorder %s1327_s16, 2  ;;  %s889_s29 = sand.u32 1, %s1315_s13  }
 0x383   : > { %s890_s25 = scalar_lea.sflag [#allocation5], %s889_s29 }
 0x384   : > { %p1123_p8 = pnand %p1130_p5, %p1433_p6 }
 0x386   : > { %p1124_p9 = pneg %p1123_p8 }
 0x388   : > { %1310 = dma.done.wait (%p1124_p9), %s890_s25, 512  }
 0x389   : > { %1312 = vsyncadd (%p1124_p9), %s890_s25, 4294966784  ;;  %s1737_s11 = sld [smem:[#allocation11_spill]]  ;;  %p22_p10 = scmp.ge.s32.totalorder %s1414_s19, 10  }
 0x38a   : > { %s1738_s13 = smov %s1319_s14  ;;  %s1739_s14 = smov %s1323_s15 }
 0x38b   : > { %s1741_s16 = smov %s1414_s19  ;;  %24 = sbr.rel (!%p22_p10) target bundleno = 8 (0x8), region = 111 }
 0x38f   : > { %s1740_s15 = smov %s1737_s11 }
 0x390   :  { %895 = vsyncpa [#allocation5], 1 }
 0x391   :  { %897 = vsyncpa [#allocation5 + $0x1], 1 }
 0x392   :  { %898 = vsyncpa [#allocation7], 1 }

</bundles_post_ra>
